<compile_context>
chip_gen: v6e
topology: v6e:2x2x1
jax: 0.10.0
libtpu: 0.0.40
codegen_flags: <defaults>
</compile_context>

<pallas_src>
import functools
import math

import jax
import jax.numpy as jnp
from jax.experimental import pallas as pl
from jax.experimental.pallas import tpu as pltpu

LANE = 128
SUBLANE = 8
NEG_BIG = -1e30  # softmax-neutral bias for padded action columns (finite, not -inf)


def _round_up(x, m):
    return ((x + m - 1) // m) * m


def make_actor_kernel(n_linear, use_softmax):
    """Kernel for an MLP with `n_linear` Linear layers, fused bias/ReLU/softmax."""

    def kernel(*refs):
        x_ref = refs[0]
        wb_refs = refs[1:1 + 2 * n_linear]
        o_ref = refs[-1]

        h = x_ref[...]                          # bf16, (TILE_B, in_pad)
        for i in range(n_linear):
            w = wb_refs[2 * i][...]             # bf16, (in_pad_i, out_pad_i)
            b = wb_refs[2 * i + 1][...]         # f32,  (1, out_pad_i)
            y = jnp.dot(h, w, preferred_element_type=jnp.float32) + b
            if i < n_linear - 1:
                # ReLU in f32 (VPU), cast back to bf16 for the next MXU issue.
                h = jnp.maximum(y, 0.0).astype(jnp.bfloat16)
            else:
                h = y                           # final logits stay f32
        if use_softmax:
            m = jnp.max(h, axis=-1, keepdims=True)
            e = jnp.exp(h - m)                  # padded cols: exp(-1e30 - m) -> 0
            denom = jnp.sum(e, axis=-1, keepdims=True)
            h = e * pl.reciprocal(denom, approx=True)
        o_ref[...] = h.astype(o_ref.dtype)

    return kernel


def init_actor_params(key, layer_num, state_dim, action_dim, hidden_units):
    """Orthogonal weights / zero biases (matches torch init).

    Returns:
      kernel_params: list of (w bf16 (in_pad, out_pad), b f32 (1, out_pad)),
                     padded once to lane-dense, (8,128)-aligned shapes.
      raw_params:    list of (w f32 (in, out), b f32 (out,)) for reference math.
    """
    dims = [state_dim] + [hidden_units] * layer_num + [action_dim]
    orth = jax.nn.initializers.orthogonal()
    kernel_params, raw_params = [], []
    n_linear = len(dims) - 1
    for i in range(n_linear):
        d_in, d_out = dims[i], dims[i + 1]
        key, sub = jax.random.split(key)
        # torch weight is (out, in); init orthogonally then transpose to (in, out).
        w = jnp.transpose(orth(sub, (d_out, d_in), jnp.float32))     # (in, out)
        b = jnp.zeros((d_out,), jnp.float32)
        raw_params.append((w, b))

        in_pad = _round_up(d_in, LANE)
        out_pad = _round_up(d_out, LANE)
        w_p = jnp.zeros((in_pad, out_pad), jnp.float32).at[:d_in, :d_out].set(w)
        # Padded output columns of the LAST layer get a large negative bias so
        # softmax over the lane-dense 128-wide output gives them ~0 probability.
        pad_bias = NEG_BIG if i == n_linear - 1 else 0.0
        b_p = jnp.full((1, out_pad), pad_bias, jnp.float32).at[0, :d_out].set(b)
        kernel_params.append((w_p.astype(jnp.bfloat16), b_p))
    return kernel_params, raw_params


@functools.partial(jax.jit, static_argnames=("action_dim", "use_softmax"))
def actor_forward(s, kernel_params, action_dim, use_softmax=True):
    """Pallas forward. Returns (probs_or_logits, None) like Actor.forward."""
    batch = s.shape[0]
    x = s.reshape(batch, -1).astype(jnp.float32)         # view(batch, -1)
    state_dim = x.shape[1]

    in_pad = kernel_params[0][0].shape[0]
    out_pad = kernel_params[-1][0].shape[1]
    n_linear = len(kernel_params)

    # Batch tiling: pipelined + (on v7x) megacore-parallel over batch tiles.
    # 2 x (256 x 128 x 4B) buffers per stream is tiny vs even v7x's 64 MiB VMEM.
    if batch >= 256:
        tile_b = 256
    else:
        tile_b = _round_up(max(batch, 1), SUBLANE)
    batch_pad = _round_up(batch, tile_b)

    # Lane-dense, sublane-aligned input (zero padding is neutral: W pad rows = 0).
    x_p = jnp.zeros((batch_pad, in_pad), jnp.bfloat16)
    x_p = x_p.at[:batch, :state_dim].set(x.astype(jnp.bfloat16))

    flat = []
    in_specs = [pl.BlockSpec((tile_b, in_pad), lambda i: (i, 0))]
    for w, b in kernel_params:
        flat += [w, b]
        # Full-array blocks with a constant index_map: stay VMEM-resident
        # across all grid steps (no re-DMA per batch tile).
        in_specs.append(pl.BlockSpec(w.shape, lambda i: (0, 0)))
        in_specs.append(pl.BlockSpec(b.shape, lambda i: (0, 0)))

    kernel = make_actor_kernel(n_linear, use_softmax)
    out_p = pl.pallas_call(
        kernel,
        out_shape=jax.ShapeDtypeStruct((batch_pad, out_pad), jnp.float32),
        grid=(batch_pad // tile_b,),
        in_specs=in_specs,
        out_specs=pl.BlockSpec((tile_b, out_pad), lambda i: (i, 0)),
        compiler_params=pltpu.CompilerParams(
            dimension_semantics=("parallel",)),
    )(x_p, *flat)

    # Slice away batch padding and the lane-padded (≈0 prob) action columns.
    return out_p[:batch, :action_dim], None


def actor_reference(s, raw_params, use_softmax=True):
    """Pure-JAX f32 reference matching the torch module."""
    x = s.reshape(s.shape[0], -1).astype(jnp.float32)
    n = len(raw_params)
    h = x
    for i, (w, b) in enumerate(raw_params):
        h = h @ w + b
        if i < n - 1:
            h = jnp.maximum(h, 0.0)
    if use_softmax:
        h = jax.nn.softmax(h, axis=-1)
    return h


if __name__ == "__main__":
    # Small shapes consistent with the module: state_shape=(4,4), action_shape=(8,)
    layer_num = 2
    state_shape = (4, 4)
    action_shape = (8,)
    hidden_units = 32
    batch = 2

    state_dim = math.prod(state_shape)
    action_dim = math.prod(action_shape)

    key = jax.random.PRNGKey(0)
    pkey, xkey = jax.random.split(key)
    kernel_params, raw_params = init_actor_params(
        pkey, layer_num, state_dim, action_dim, hidden_units)

    # Input observation: (batch, *state_shape) — flattened inside forward.
    s = jax.random.normal(xkey, (batch,) + state_shape, jnp.float32)

    probs, _ = actor_forward(s, kernel_params, action_dim=action_dim,
                             use_softmax=True)
    probs = jax.block_until_ready(probs)

    ref = actor_reference(s, raw_params, use_softmax=True)

    assert probs.shape == (batch, action_dim)
    # bf16 matmul inputs + approx EUP reciprocal -> modest tolerance vs f32 ref.
    assert jnp.allclose(jnp.sum(probs, axis=-1), 1.0, atol=1e-2)
    assert jnp.allclose(probs, ref, atol=2e-2, rtol=2e-2)

    print("KERNEL_OK")
</pallas_src>

<mosaic_0001>
module attributes {stable_mosaic.version = 11 : i64} {
  func.func @kernel(%arg0: i32, %arg1: memref<8x128xbf16, #tpu.memory_space<vmem>>, %arg2: memref<128x128xbf16, #tpu.memory_space<vmem>>, %arg3: memref<1x128xf32, #tpu.memory_space<vmem>>, %arg4: memref<128x128xbf16, #tpu.memory_space<vmem>>, %arg5: memref<1x128xf32, #tpu.memory_space<vmem>>, %arg6: memref<128x128xbf16, #tpu.memory_space<vmem>>, %arg7: memref<1x128xf32, #tpu.memory_space<vmem>>, %arg8: memref<8x128xf32, #tpu.memory_space<vmem>>) attributes {dimension_semantics = [#tpu.dimension_semantics<parallel>], iteration_bounds = array<i64: 1>, scalar_prefetch = 0 : i64, scratch_operands = 0 : i64, tpu.core_type = #tpu.core_type<tc>, window_params = [{transform_indices = @transform_0, window_bounds = array<i64: 8, 128>}, {pipeline_mode = #tpu.pipeline_mode<synchronous>, transform_indices = @transform_1, window_bounds = array<i64: 128, 128>}, {pipeline_mode = #tpu.pipeline_mode<synchronous>, transform_indices = @transform_2, window_bounds = array<i64: 1, 128>}, {pipeline_mode = #tpu.pipeline_mode<synchronous>, transform_indices = @transform_3, window_bounds = array<i64: 128, 128>}, {pipeline_mode = #tpu.pipeline_mode<synchronous>, transform_indices = @transform_4, window_bounds = array<i64: 1, 128>}, {pipeline_mode = #tpu.pipeline_mode<synchronous>, transform_indices = @transform_5, window_bounds = array<i64: 128, 128>}, {pipeline_mode = #tpu.pipeline_mode<synchronous>, transform_indices = @transform_6, window_bounds = array<i64: 1, 128>}, {transform_indices = @transform_7, window_bounds = array<i64: 8, 128>}]} {
    %c0 = arith.constant 0 : index
    %c0_0 = arith.constant 0 : index
    %0 = vector.load %arg1[%c0, %c0_0] : memref<8x128xbf16, #tpu.memory_space<vmem>>, vector<8x128xbf16>
    %c0_1 = arith.constant 0 : index
    %c0_2 = arith.constant 0 : index
    %1 = vector.load %arg2[%c0_1, %c0_2] : memref<128x128xbf16, #tpu.memory_space<vmem>>, vector<128x128xbf16>
    %c0_3 = arith.constant 0 : index
    %c0_4 = arith.constant 0 : index
    %2 = vector.load %arg3[%c0_3, %c0_4] : memref<1x128xf32, #tpu.memory_space<vmem>>, vector<1x128xf32>
    %cst = arith.constant dense<0.000000e+00> : vector<8x128xf32>
    %3 = tpu.matmul %0, %1, %cst {dimension_numbers = #tpu.dot_dimension_numbers<[1], [0], [0], [1], [0, 0, 1, 1], [], []>} : vector<8x128xbf16>, vector<128x128xbf16>, vector<8x128xf32> -> vector<8x128xf32>
    %4 = vector.broadcast %2 : vector<1x128xf32> to vector<8x128xf32>
    %5 = arith.addf %3, %4 : vector<8x128xf32>
    %cst_5 = arith.constant 0.000000e+00 : f32
    %6 = vector.broadcast %cst_5 : f32 to vector<8x128xf32>
    %7 = arith.maximumf %5, %6 : vector<8x128xf32>
    %8 = arith.truncf %7 : vector<8x128xf32> to vector<8x128xbf16>
    %c0_6 = arith.constant 0 : index
    %c0_7 = arith.constant 0 : index
    %9 = vector.load %arg4[%c0_6, %c0_7] : memref<128x128xbf16, #tpu.memory_space<vmem>>, vector<128x128xbf16>
    %c0_8 = arith.constant 0 : index
    %c0_9 = arith.constant 0 : index
    %10 = vector.load %arg5[%c0_8, %c0_9] : memref<1x128xf32, #tpu.memory_space<vmem>>, vector<1x128xf32>
    %cst_10 = arith.constant dense<0.000000e+00> : vector<8x128xf32>
    %11 = tpu.matmul %8, %9, %cst_10 {dimension_numbers = #tpu.dot_dimension_numbers<[1], [0], [0], [1], [0, 0, 1, 1], [], []>} : vector<8x128xbf16>, vector<128x128xbf16>, vector<8x128xf32> -> vector<8x128xf32>
    %12 = vector.broadcast %10 : vector<1x128xf32> to vector<8x128xf32>
    %13 = arith.addf %11, %12 : vector<8x128xf32>
    %cst_11 = arith.constant 0.000000e+00 : f32
    %14 = vector.broadcast %cst_11 : f32 to vector<8x128xf32>
    %15 = arith.maximumf %13, %14 : vector<8x128xf32>
    %16 = arith.truncf %15 : vector<8x128xf32> to vector<8x128xbf16>
    %c0_12 = arith.constant 0 : index
    %c0_13 = arith.constant 0 : index
    %17 = vector.load %arg6[%c0_12, %c0_13] : memref<128x128xbf16, #tpu.memory_space<vmem>>, vector<128x128xbf16>
    %c0_14 = arith.constant 0 : index
    %c0_15 = arith.constant 0 : index
    %18 = vector.load %arg7[%c0_14, %c0_15] : memref<1x128xf32, #tpu.memory_space<vmem>>, vector<1x128xf32>
    %cst_16 = arith.constant dense<0.000000e+00> : vector<8x128xf32>
    %19 = tpu.matmul %16, %17, %cst_16 {dimension_numbers = #tpu.dot_dimension_numbers<[1], [0], [0], [1], [0, 0, 1, 1], [], []>} : vector<8x128xbf16>, vector<128x128xbf16>, vector<8x128xf32> -> vector<8x128xf32>
    %20 = vector.broadcast %18 : vector<1x128xf32> to vector<8x128xf32>
    %21 = arith.addf %19, %20 : vector<8x128xf32>
    %cst_17 = arith.constant dense<0xFF800000> : vector<8xf32>
    %22 = vector.multi_reduction <maximumf>, %21, %cst_17 [1] : vector<8x128xf32> to vector<8xf32>
    %23 = vector.shape_cast %22 : vector<8xf32> to vector<8x1xf32>
    %24 = vector.broadcast %23 : vector<8x1xf32> to vector<8x128xf32>
    %25 = arith.subf %21, %24 : vector<8x128xf32>
    %26 = math.exp %25 : vector<8x128xf32>
    %cst_18 = arith.constant dense<0.000000e+00> : vector<8xf32>
    %27 = vector.multi_reduction <add>, %26, %cst_18 [1] : vector<8x128xf32> to vector<8xf32>
    %28 = vector.shape_cast %27 : vector<8xf32> to vector<8x1xf32>
    %29 = tpu.reciprocal %28 {approx = true} : vector<8x1xf32> -> vector<8x1xf32>
    %30 = vector.broadcast %29 : vector<8x1xf32> to vector<8x128xf32>
    %31 = arith.mulf %26, %30 : vector<8x128xf32>
    %c0_19 = arith.constant 0 : index
    %c0_20 = arith.constant 0 : index
    %32 = vector.load %arg8[%c0_19, %c0_20] : memref<8x128xf32, #tpu.memory_space<vmem>>, vector<8x128xf32>
    tpu.vector_store %arg8[%c0_19, %c0_20], %31 {strides = array<i32>} : memref<8x128xf32, #tpu.memory_space<vmem>>, vector<8x128xf32>,
    return
  }
  func.func @transform_0(%arg0: i32) -> (i32, i32) {
    %c0_i32 = arith.constant 0 : i32
    %c0_i32_0 = arith.constant 0 : i32
    return %arg0, %c0_i32 : i32, i32
  }
  func.func @transform_1(%arg0: i32) -> (i32, i32) {
    %c0_i32 = arith.constant 0 : i32
    %c0_i32_0 = arith.constant 0 : i32
    %c0_i32_1 = arith.constant 0 : i32
    return %c0_i32, %c0_i32_0 : i32, i32
  }
  func.func @transform_2(%arg0: i32) -> (i32, i32) {
    %c0_i32 = arith.constant 0 : i32
    %c0_i32_0 = arith.constant 0 : i32
    %c0_i32_1 = arith.constant 0 : i32
    return %c0_i32, %c0_i32_0 : i32, i32
  }
  func.func @transform_3(%arg0: i32) -> (i32, i32) {
    %c0_i32 = arith.constant 0 : i32
    %c0_i32_0 = arith.constant 0 : i32
    %c0_i32_1 = arith.constant 0 : i32
    return %c0_i32, %c0_i32_0 : i32, i32
  }
  func.func @transform_4(%arg0: i32) -> (i32, i32) {
    %c0_i32 = arith.constant 0 : i32
    %c0_i32_0 = arith.constant 0 : i32
    %c0_i32_1 = arith.constant 0 : i32
    return %c0_i32, %c0_i32_0 : i32, i32
  }
  func.func @transform_5(%arg0: i32) -> (i32, i32) {
    %c0_i32 = arith.constant 0 : i32
    %c0_i32_0 = arith.constant 0 : i32
    %c0_i32_1 = arith.constant 0 : i32
    return %c0_i32, %c0_i32_0 : i32, i32
  }
  func.func @transform_6(%arg0: i32) -> (i32, i32) {
    %c0_i32 = arith.constant 0 : i32
    %c0_i32_0 = arith.constant 0 : i32
    %c0_i32_1 = arith.constant 0 : i32
    return %c0_i32, %c0_i32_0 : i32, i32
  }
  func.func @transform_7(%arg0: i32) -> (i32, i32) {
    %c0_i32 = arith.constant 0 : i32
    %c0_i32_0 = arith.constant 0 : i32
    return %arg0, %c0_i32 : i32, i32
  }
}

</mosaic_0001>

<bundles_post_ra>
// kernel: actor_forward.1
= control target key start
LH: loop header
LB: loop body
LE: loop exit
PB: predicated region body
PF: predicated region fallthrough
CT: control target
= control target key end

     0   :  { %12 = vsyncpa [#allocation3], 0  ;;  %s736_s0 = inlined_call_operand.vmem [shape: bf16[8,128], index: 0, kind: input, shape index: {}]   ;;  %s737_s1 = inlined_call_operand.hbm [shape: bf16[128,128], index: 1, kind: input, shape index: {}]   ;;  %s738_s2 = inlined_call_operand.vmem [shape: f32[1,128], index: 2, kind: input, shape index: {}]   ;;  %s739_s3 = inlined_call_operand.hbm [shape: bf16[128,128], index: 3, kind: input, shape index: {}]   ;;  %s740_s4 = inlined_call_operand.vmem [shape: f32[1,128], index: 4, kind: input, shape index: {}]   ;;  %s741_s5 = inlined_call_operand.hbm [shape: bf16[128,128], index: 5, kind: input, shape index: {}]   ;;  %s742_s6 = inlined_call_operand.vmem [shape: f32[1,128], index: 6, kind: input, shape index: {}]   ;;  %s743_s7 = inlined_call_operand.vmem [shape: f32[8,128], index: 7, kind: output, shape index: {}]  }
   0x1   :  { %13 = vsyncpa [#allocation5], 0  ;;  %s635_s24 = smov [#allocation4]   ;;  %s636_s26 = smov [#allocation2]  }
   0x2   :  { %s35_s25 = sshll.u32 %s635_s24, 4  ;;  %s21_s27 = sshll.u32 %s636_s26, 4  ;;  %s36_s25 = int_to_ptr.vmem [resolvable:$true] %s35_s25  ;;  %s22_s27 = int_to_ptr.vmem [resolvable:$true] %s21_s27 }
   0x3   :  { %s579_s28 = scalar_lea.vmem %s36_s25, 1024  ;;  %p584_p1 = scmp.lt.s32.totalorder %s36_s25, %s36_s25 }
   0x4   :  { %p580_p0 = scmp.ne.s32.totalorder %s36_s25, %s579_s28  ;;  %p585_p2 = scmp.lt.s32.totalorder %s579_s28, %s579_s28 }
   0x6   :  { %p586_p3 = por %p585_p2, %p584_p1 }
   0x8   :  { %p587_p4 = pnand %p586_p3, %p580_p0 }
   0xa   :  { %590 = shalt.err (!%p587_p4)
}
   0xb   :  { %s637_s29 = smov 64   ;;  %s638_s30 = smov 4  }
   0xc   :  { %41 = dma.hbm_to_vmem [thread:$0]  %s739_s3, 1024, %s36_s25, [#allocation5], %s637_s29, %s637_s29, %s638_s30  }
   0xd   :  { %s599_s10 = scalar_lea.vmem %s22_s27, 1024  ;;  %p604_p6 = scmp.lt.s32.totalorder %s22_s27, %s22_s27 }
   0xe   :  { %p600_p5 = scmp.ne.s32.totalorder %s22_s27, %s599_s10  ;;  %p605_p7 = scmp.lt.s32.totalorder %s599_s10, %s599_s10 }
  0x10   :  { %p606_p8 = por %p605_p7, %p604_p6 }
  0x12   :  { %p607_p9 = pnand %p606_p8, %p600_p5 }
  0x14   :  { %610 = shalt.err (!%p607_p9)
}
  0x15   :  { %27 = dma.hbm_to_vmem [thread:$0]  %s737_s1, 1024, %s22_s27, [#allocation3], %s637_s29, %s637_s29, %s638_s30  }
  0x16   :  { %s639_s13 = smov [#allocation6]  }
  0x17   :  { %s49_s14 = sshll.u32 %s639_s13, 4  ;;  %s50_s14 = int_to_ptr.vmem [resolvable:$true] %s49_s14 }
  0x18   :  { %s619_s15 = scalar_lea.vmem %s50_s14, 1024  ;;  %p624_p11 = scmp.lt.s32.totalorder %s50_s14, %s50_s14 }
  0x19   :  { %p620_p10 = scmp.ne.s32.totalorder %s50_s14, %s619_s15  ;;  %p625_p12 = scmp.lt.s32.totalorder %s619_s15, %s619_s15 }
  0x1b   :  { %p626_p13 = por %p625_p12, %p624_p11 }
  0x1d   :  { %p627_p0 = pnand %p626_p13, %p620_p10 }
  0x1f   :  { %630 = shalt.err (!%p627_p0)
}
  0x20   :  { %55 = dma.hbm_to_vmem [thread:$0]  %s741_s5, 1024, %s50_s14, [#allocation5], %s637_s29, %s637_s29, %s638_s30  }
  0x21   :  { %631 = dma.done.wait [#allocation3], 1024  }
  0x22   :  { %632 = vsyncadd [#allocation3], 4294966272 }
  0x23   :  { %633 = dma.done.wait [#allocation5], 2048  }
  0x24   :  { %634 = vsyncadd [#allocation5], 4294965248  ;;  %v640_v0 = vmov 0.0   ;;  %vm641_vm0 = vmmov 0   ;;  %v543_v1 = vld [vmem:[#allocation2 + $0x38] sm:$0xff]   ;;  %v544_v2 = vld [vmem:[#allocation2 + $0x30] sm:$0xff]  }
  0x25   :  { %476 = vmatprep.subr.bf16.mxu0 %v640_v0  ;;  %492 = vmatprep.mubr.msk.bf16.mxu0 %vm641_vm0, %v640_v0  ;;  %v545_v3 = vld [vmem:[#allocation2 + $0x28] sm:$0xff]   ;;  %v551_v4 = vld [vmem:[#allocation4 + $0x38] sm:$0xff]   ;;  %v546_v5 = vld [vmem:[#allocation2 + $0x20] sm:$0xff]  }
  0x26   :  { %496 = vmatprep.subr.bf16.mxu1 %v640_v0  ;;  %512 = vmatprep.mubr.msk.bf16.mxu1 %vm641_vm0, %v640_v0  ;;  %v552_v6 = vld [vmem:[#allocation4 + $0x30] sm:$0xff]   ;;  %v547_v7 = vld [vmem:[#allocation2 + $0x18] sm:$0xff]   ;;  %v553_v8 = vld [vmem:[#allocation4 + $0x28] sm:$0xff]  }
  0x27   :  { %477 = vmatpush3.bf16.msra.mxu0 %v543_v1  ;;  %497 = vmatpush3.bf16.msra.mxu1 %v551_v4  ;;  %v548_v9 = vld [vmem:[#allocation2 + $0x10] sm:$0xff]   ;;  %v554_v10 = vld [vmem:[#allocation4 + $0x20] sm:$0xff]   ;;  %v549_v11 = vld [vmem:[#allocation2 + $0x8] sm:$0xff]  }
  0x28   :  { %478 = vmatprep.subr.bf16.mxu0 %v640_v0  ;;  %498 = vmatprep.subr.bf16.mxu1 %v640_v0  ;;  %v555_v12 = vld [vmem:[#allocation4 + $0x18] sm:$0xff]   ;;  %v550_v13 = vld [vmem:[#allocation2] sm:$0xff]   ;;  %v556_v14 = vld [vmem:[#allocation4 + $0x10] sm:$0xff]  }
  0x29   :  { %v68_v15 = vld [vmem:[%s736_s0] sm:$0xf]  ;;  %v557_v16 = vld [vmem:[#allocation4 + $0x8] sm:$0xff]   ;;  %v559_v18 = vld [vmem:[#allocation6 + $0x38] sm:$0xff]  }
  0x2a   :  { %v558_v17 = vld [vmem:[#allocation4] sm:$0xff]   ;;  %v560_v19 = vld [vmem:[#allocation6 + $0x30] sm:$0xff]   ;;  %v561_v20 = vld [vmem:[#allocation6 + $0x28] sm:$0xff]  }
  0x2b   :  { %479 = vmatpush3.bf16.msra.mxu0 %v544_v2  ;;  %499 = vmatpush3.bf16.msra.mxu1 %v552_v6  ;;  %v562_v21 = vld [vmem:[#allocation6 + $0x20] sm:$0xff]   ;;  %v563_v22 = vld [vmem:[#allocation6 + $0x18] sm:$0xff]   ;;  %v564_v23 = vld [vmem:[#allocation6 + $0x10] sm:$0xff]  }
  0x2c   :  { %480 = vmatprep.subr.bf16.mxu0 %v640_v0  ;;  %500 = vmatprep.subr.bf16.mxu1 %v640_v0  ;;  %v422_v24 = vld [vmem:[%s738_s2] ss:$0 sm:$0xff]  ;;  %v565_v32 = vld [vmem:[#allocation6 + $0x8] sm:$0xff]  }
  0x2d   :  { %v566_v33 = vld [vmem:[#allocation6] sm:$0xff]  }
  0x2e   :  { %v431_v34 = vld [vmem:[%s740_s4] ss:$0 sm:$0xff] }
  0x2f   :  { %481 = vmatpush3.bf16.msra.mxu0 %v545_v3  ;;  %501 = vmatpush3.bf16.msra.mxu1 %v553_v8  ;;  %v440_v42 = vld [vmem:[%s742_s6] ss:$0 sm:$0xff] }
  0x30   :  { %482 = vmatprep.subr.bf16.mxu0 %v640_v0  ;;  %502 = vmatprep.subr.bf16.mxu1 %v640_v0 }
  0x33   :  { %483 = vmatpush3.bf16.msra.mxu0 %v546_v5  ;;  %503 = vmatpush3.bf16.msra.mxu1 %v554_v10 }
  0x34   :  { %484 = vmatprep.subr.bf16.mxu0 %v640_v0  ;;  %504 = vmatprep.subr.bf16.mxu1 %v640_v0 }
  0x37   :  { %485 = vmatpush3.bf16.msra.mxu0 %v547_v7  ;;  %505 = vmatpush3.bf16.msra.mxu1 %v555_v12 }
  0x38   :  { %486 = vmatprep.subr.bf16.mxu0 %v640_v0  ;;  %506 = vmatprep.subr.bf16.mxu1 %v640_v0 }
  0x3b   :  { %487 = vmatpush3.bf16.msra.mxu0 %v548_v9  ;;  %507 = vmatpush3.bf16.msra.mxu1 %v556_v14 }
  0x3c   :  { %488 = vmatprep.subr.bf16.mxu0 %v640_v0  ;;  %508 = vmatprep.subr.bf16.mxu1 %v640_v0 }
  0x3f   :  { %489 = vmatpush3.bf16.msra.mxu0 %v549_v11  ;;  %509 = vmatpush3.bf16.msra.mxu1 %v557_v16 }
  0x40   :  { %490 = vmatprep.subr.bf16.mxu0 %v640_v0  ;;  %510 = vmatprep.subr.bf16.mxu1 %v640_v0 }
  0x43   :  { %491 = vmatpush3.bf16.msra.mxu0 %v550_v13  ;;  %511 = vmatpush3.bf16.msra.mxu1 %v558_v17 }
  0x44   :  { %516 = vmatprep.subr.bf16.mxu0 %v640_v0 }
  0x46   :  { %493 = vmatmul.mubr.bf16.vlgmr.msra.gmra.mxu0 %v68_v15 }
  0x47   :  { %532 = vmatprep.mubr.msk.bf16.mxu0 %vm641_vm0, %v640_v0  ;;  %517 = vmatpush3.bf16.msra.mxu0 %v559_v18 }
  0x48   :  { %518 = vmatprep.subr.bf16.mxu0 %v640_v0 }
  0x4b   :  { %519 = vmatpush3.bf16.msra.mxu0 %v560_v19 }
  0x4c   :  { %520 = vmatprep.subr.bf16.mxu0 %v640_v0 }
  0x4f   :  { %521 = vmatpush3.bf16.msra.mxu0 %v561_v20 }
  0x50   :  { %522 = vmatprep.subr.bf16.mxu0 %v640_v0 }
  0x53   :  { %523 = vmatpush3.bf16.msra.mxu0 %v562_v21 }
  0x54   :  { %524 = vmatprep.subr.bf16.mxu0 %v640_v0 }
  0x57   :  { %525 = vmatpush3.bf16.msra.mxu0 %v563_v22 }
  0x58   :  { %526 = vmatprep.subr.bf16.mxu0 %v640_v0 }
  0x5b   :  { %527 = vmatpush3.bf16.msra.mxu0 %v564_v23 }
  0x5c   :  { %528 = vmatprep.subr.bf16.mxu0 %v640_v0 }
  0x5f   :  { %529 = vmatpush3.bf16.msra.mxu0 %v565_v32 }
  0x60   :  { %530 = vmatprep.subr.bf16.mxu0 %v640_v0 }
  0x63   :  { %531 = vmatpush3.bf16.msra.mxu0 %v566_v33 }
 0x106   :  { %v174_v25 = vpop.f32.mrf.mxu0 }
 0x107   :  { %v175_v26 = vadd.f32 %v422_v24, %v174_v25 }
 0x108   :  { %v494_v27 = vpop.f32.mrf.mxu0 }
 0x109   :  { %v180_v28 = vmax.f32 %v175_v26, 0.0 }
 0x10a   :  { %v177_v29 = vpop.f32.mrf.mxu0 }
 0x10b   :  { %v181_v30 = vpack.c.bf16 %v180_v28, %v180_v28 }
 0x10c   :  { %v495_v31 = vpop.f32.mrf.mxu0 }
 0x10d   :  { %513 = vmatmul.mubr.bf16.vlgmr.msra.gmra.mxu1 %v181_v30 }
 0x1cd   :  { %v287_v35 = vpop.f32.mrf.mxu1 }
 0x1ce   :  { %v288_v36 = vadd.f32 %v431_v34, %v287_v35 }
 0x1cf   :  { %v514_v37 = vpop.f32.mrf.mxu1 }
 0x1d0   :  { %v293_v38 = vmax.f32 %v288_v36, 0.0 }
 0x1d1   :  { %v290_v39 = vpop.f32.mrf.mxu1 }
 0x1d2   :  { %v294_v40 = vpack.c.bf16 %v293_v38, %v293_v38 }
 0x1d3   :  { %v515_v41 = vpop.f32.mrf.mxu1 }
 0x1d4   :  { %533 = vmatmul.mubr.bf16.vlgmr.msra.gmra.mxu0 %v294_v40 }
 0x294   :  { %v400_v43 = vpop.f32.mrf.mxu0 }
 0x295   :  { %v401_v44 = vadd.f32 %v440_v42, %v400_v43 }
 0x296   :  { %v534_v45 = vpop.f32.mrf.mxu0 }
 0x297   :  { %406 = vmax.xlane.f32.xlu0 %v401_v44 }
 0x298   :  { %v403_v46 = vpop.f32.mrf.mxu0 }
 0x29a   :  { %v535_v47 = vpop.f32.mrf.mxu0 }
 0x320   :  { %v407_v48 = vpop.xlane.xlu0 %406 }
 0x321   :  { %v408_v49 = vsub.f32 %v401_v44, %v407_v48 }
 0x323   :  { %v409_v50 = vmul.f32 1.442695, %v408_v49 }
 0x325   :  { %567 = vpow2.f32 %v409_v50 }
 0x332   :  { %v568_v51 = vpop.eup %567 }
 0x333   :  { %411 = vadd.xlane.f32.xlu0 %v568_v51 }
 0x3bc   :  { %v412_v52 = vpop.xlane.xlu0 %411 }
 0x3bd   :  { %569 = vrcp.f32 %v412_v52 }
 0x3ca   :  { %v570_v53 = vpop.eup %569 }
 0x3cb   :  { %v414_v54 = vmul.f32 %v570_v53, %v568_v51 }
 0x3cd   :  { %415 = vst [vmem:[%s743_s7] sm:$0xff] %v414_v54 }
 0x3ce   :  { %420 = vsyncpa [#allocation3], 1 }
 0x3cf   :  { %421 = vsyncpa [#allocation5], 1 }

</bundles_post_ra>
